<compile_context>
chip_gen: v5e
topology: v5e:2x2
jax: 0.10.0
libtpu: 0.0.40
codegen_flags: <defaults>
</compile_context>

<pallas_src>
import jax
import jax.numpy as jnp
from jax.experimental import pallas as pl
from jax.experimental.pallas import tpu as pltpu

HID = 128


def _round_up(n, m):
    return ((n + m - 1) // m) * m


def sampler_kernel(x_ref, w_ref, b_ref, eps_ref, out_ref):
    x = x_ref[...]                                                   # [TB, 128]

    # Single fused matmul on the MXU: [TB,128] @ [128,256] -> [TB,256] (f32 acc).
    mulv = jnp.dot(x, w_ref[...], preferred_element_type=jnp.float32) + b_ref[...]
    mu = mulv[:, 0:HID]                                              # lane-aligned slice
    logvar = mulv[:, HID:2 * HID]

    # Reparameterization + KLD (VPU / EUP elementwise); exp(logvar) = std*std
    # saves one EUP transcendental per element.
    std = jnp.exp(0.5 * logvar)
    exp_logvar = std * std
    z = eps_ref[...] * std + mu
    kld = 1.0 + logvar - mu * mu - exp_logvar

    # torch.cat([z, kld], dim=1): both stores are 128-lane aligned, 256-lane dense.
    out_ref[:, 0:HID] = z.astype(out_ref.dtype)
    out_ref[:, HID:2 * HID] = kld.astype(out_ref.dtype)


def prepare_params(w_mu, b_mu, w_var, b_var):
    """One-time parameter prep. PyTorch layout in: weight [out, in], bias [out].

    Returns (w_cat [128, 256], b_cat [1, 256]) with lanes 0:128 -> mu head and
    lanes 128:256 -> logvar head.
    """
    w_cat = jnp.concatenate(
        [jnp.asarray(w_mu, jnp.float32).T, jnp.asarray(w_var, jnp.float32).T], axis=1
    )
    b_cat = jnp.concatenate(
        [jnp.asarray(b_mu, jnp.float32), jnp.asarray(b_var, jnp.float32)]
    ).reshape(1, 2 * HID)
    return w_cat, b_cat


def sampler_forward(x, w_cat, b_cat, eps, *, block_b=1024):
    """x: [B, 128]; w_cat: [128, 256]; b_cat: [1, 256]; eps: [B, 128]."""
    B = x.shape[0]
    x = jnp.asarray(x, jnp.float32)
    eps = jnp.asarray(eps, jnp.float32)

    # Batch tile: big enough to amortize per-step overhead, capped so the
    # double-buffered working set stays small even on v7x (64 MiB VMEM).
    TB = min(block_b, _round_up(B, 8))
    Bp = _round_up(B, TB)
    if Bp != B:
        pad = Bp - B
        x = jnp.pad(x, ((0, pad), (0, 0)))
        eps = jnp.pad(eps, ((0, pad), (0, 0)))

    out = pl.pallas_call(
        sampler_kernel,
        out_shape=jax.ShapeDtypeStruct((Bp, 2 * HID), jnp.float32),
        grid=(Bp // TB,),
        in_specs=[
            pl.BlockSpec((TB, HID), lambda i: (i, 0)),        # x       (per-tile)
            pl.BlockSpec((HID, 2 * HID), lambda i: (0, 0)),   # Wcat    (resident)
            pl.BlockSpec((1, 2 * HID), lambda i: (0, 0)),     # bcat    (resident)
            pl.BlockSpec((TB, HID), lambda i: (i, 0)),        # eps     (per-tile)
        ],
        out_specs=pl.BlockSpec((TB, 2 * HID), lambda i: (i, 0)),
        compiler_params=pltpu.CompilerParams(
            dimension_semantics=("parallel",),                # v7x: shard across 2 TCs
            vmem_limit_bytes=32 * 1024 * 1024,
        ),
    )(x, w_cat, b_cat, eps)

    if Bp != B:
        out = out[:B]
    return out


def sampler_reference(x, w_mu, b_mu, w_var, b_var, eps):
    mu = x @ w_mu.T + b_mu
    logvar = x @ w_var.T + b_var
    std = jnp.exp(0.5 * logvar)
    kld = 1.0 + logvar - mu ** 2 - jnp.exp(logvar)
    return jnp.concatenate([eps * std + mu, kld], axis=1)


if __name__ == "__main__":
    key = jax.random.PRNGKey(0)
    k_x, k_wmu, k_bmu, k_wvar, k_bvar, k_eps = jax.random.split(key, 6)

    B = 8  # small demo batch (multiple of 8 for clean sublane tiling)

    # Deterministic "parameter init" (PyTorch Linear layout: weight [out, in], bias [out]).
    bound = 1.0 / jnp.sqrt(jnp.float32(HID))
    x = jax.random.normal(k_x, (B, HID), jnp.float32)
    w_mu = jax.random.uniform(k_wmu, (HID, HID), jnp.float32, -bound, bound)
    b_mu = jax.random.uniform(k_bmu, (HID,), jnp.float32, -bound, bound)
    w_var = jax.random.uniform(k_wvar, (HID, HID), jnp.float32, -bound, bound)
    b_var = jax.random.uniform(k_bvar, (HID,), jnp.float32, -bound, bound)
    eps = jax.random.normal(k_eps, (B, HID), jnp.float32)  # torch.randn_like(std)

    # One-time parameter preprocessing (fused weight / bias).
    w_cat, b_cat = prepare_params(w_mu, b_mu, w_var, b_var)

    out = sampler_forward(x, w_cat, b_cat, eps)
    out = jax.block_until_ready(out)

    ref = sampler_reference(x, w_mu, b_mu, w_var, b_var, eps)
    assert out.shape == (B, 2 * HID), out.shape
    assert jnp.allclose(out, ref, atol=1e-4, rtol=1e-4), "mismatch vs reference"

    print("KERNEL_OK")
</pallas_src>

<mosaic_0001>
module attributes {stable_mosaic.version = 11 : i64} {
  func.func @sampler_kernel(%arg0: i32, %arg1: memref<8x128xf32, #tpu.memory_space<vmem>>, %arg2: memref<128x256xf32, #tpu.memory_space<vmem>>, %arg3: memref<1x256xf32, #tpu.memory_space<vmem>>, %arg4: memref<8x128xf32, #tpu.memory_space<vmem>>, %arg5: memref<8x256xf32, #tpu.memory_space<vmem>>) attributes {dimension_semantics = [#tpu.dimension_semantics<parallel>], iteration_bounds = array<i64: 1>, scalar_prefetch = 0 : i64, scratch_operands = 0 : i64, tpu.core_type = #tpu.core_type<tc>, window_params = [{transform_indices = @transform_0, window_bounds = array<i64: 8, 128>}, {pipeline_mode = #tpu.pipeline_mode<synchronous>, transform_indices = @transform_1, window_bounds = array<i64: 128, 256>}, {pipeline_mode = #tpu.pipeline_mode<synchronous>, transform_indices = @transform_2, window_bounds = array<i64: 1, 256>}, {transform_indices = @transform_3, window_bounds = array<i64: 8, 128>}, {transform_indices = @transform_4, window_bounds = array<i64: 8, 256>}]} {
    %c0 = arith.constant 0 : index
    %c0_0 = arith.constant 0 : index
    %0 = vector.load %arg1[%c0, %c0_0] : memref<8x128xf32, #tpu.memory_space<vmem>>, vector<8x128xf32>
    %c0_1 = arith.constant 0 : index
    %c0_2 = arith.constant 0 : index
    %1 = vector.load %arg2[%c0_1, %c0_2] : memref<128x256xf32, #tpu.memory_space<vmem>>, vector<128x256xf32>
    %cst = arith.constant dense<0.000000e+00> : vector<8x256xf32>
    %2 = tpu.matmul %0, %1, %cst {dimension_numbers = #tpu.dot_dimension_numbers<[1], [0], [0], [1], [0, 0, 1, 1], [], []>} : vector<8x128xf32>, vector<128x256xf32>, vector<8x256xf32> -> vector<8x256xf32>
    %c0_3 = arith.constant 0 : index
    %c0_4 = arith.constant 0 : index
    %3 = vector.load %arg3[%c0_3, %c0_4] : memref<1x256xf32, #tpu.memory_space<vmem>>, vector<1x256xf32>
    %4 = vector.broadcast %3 : vector<1x256xf32> to vector<8x256xf32>
    %5 = arith.addf %2, %4 : vector<8x256xf32>
    %6 = vector.extract_strided_slice %5 {offsets = [0, 0], sizes = [8, 128], strides = [1, 1]} : vector<8x256xf32> to vector<8x128xf32>
    %7 = vector.extract_strided_slice %5 {offsets = [0, 128], sizes = [8, 128], strides = [1, 1]} : vector<8x256xf32> to vector<8x128xf32>
    %cst_5 = arith.constant 5.000000e-01 : f32
    %8 = vector.broadcast %cst_5 : f32 to vector<8x128xf32>
    %9 = arith.mulf %8, %7 : vector<8x128xf32>
    %10 = math.exp %9 : vector<8x128xf32>
    %11 = arith.mulf %10, %10 : vector<8x128xf32>
    %c0_6 = arith.constant 0 : index
    %c0_7 = arith.constant 0 : index
    %12 = vector.load %arg4[%c0_6, %c0_7] : memref<8x128xf32, #tpu.memory_space<vmem>>, vector<8x128xf32>
    %13 = arith.mulf %12, %10 : vector<8x128xf32>
    %14 = arith.addf %13, %6 : vector<8x128xf32>
    %cst_8 = arith.constant 1.000000e+00 : f32
    %15 = vector.broadcast %cst_8 : f32 to vector<8x128xf32>
    %16 = arith.addf %15, %7 : vector<8x128xf32>
    %17 = arith.mulf %6, %6 : vector<8x128xf32>
    %18 = arith.subf %16, %17 : vector<8x128xf32>
    %19 = arith.subf %18, %11 : vector<8x128xf32>
    %c0_9 = arith.constant 0 : index
    %c0_10 = arith.constant 0 : index
    %20 = vector.load %arg5[%c0_9, %c0_10] : memref<8x256xf32, #tpu.memory_space<vmem>>, vector<8x128xf32>
    tpu.vector_store %arg5[%c0_9, %c0_10], %14 {strides = array<i32>} : memref<8x256xf32, #tpu.memory_space<vmem>>, vector<8x128xf32>,
    %c0_11 = arith.constant 0 : index
    %c128 = arith.constant 128 : index
    %21 = vector.load %arg5[%c0_11, %c128] : memref<8x256xf32, #tpu.memory_space<vmem>>, vector<8x128xf32>
    tpu.vector_store %arg5[%c0_11, %c128], %19 {strides = array<i32>} : memref<8x256xf32, #tpu.memory_space<vmem>>, vector<8x128xf32>,
    return
  }
  func.func @transform_0(%arg0: i32) -> (i32, i32) {
    %c0_i32 = arith.constant 0 : i32
    %c0_i32_0 = arith.constant 0 : i32
    return %arg0, %c0_i32 : i32, i32
  }
  func.func @transform_1(%arg0: i32) -> (i32, i32) {
    %c0_i32 = arith.constant 0 : i32
    %c0_i32_0 = arith.constant 0 : i32
    %c0_i32_1 = arith.constant 0 : i32
    return %c0_i32, %c0_i32_0 : i32, i32
  }
  func.func @transform_2(%arg0: i32) -> (i32, i32) {
    %c0_i32 = arith.constant 0 : i32
    %c0_i32_0 = arith.constant 0 : i32
    %c0_i32_1 = arith.constant 0 : i32
    return %c0_i32, %c0_i32_0 : i32, i32
  }
  func.func @transform_3(%arg0: i32) -> (i32, i32) {
    %c0_i32 = arith.constant 0 : i32
    %c0_i32_0 = arith.constant 0 : i32
    return %arg0, %c0_i32 : i32, i32
  }
  func.func @transform_4(%arg0: i32) -> (i32, i32) {
    %c0_i32 = arith.constant 0 : i32
    %c0_i32_0 = arith.constant 0 : i32
    return %arg0, %c0_i32 : i32, i32
  }
}

</mosaic_0001>

<bundles_post_ra>
// kernel: tpu_custom_call.1
= control target key start
LH: loop header
LB: loop body
LE: loop exit
PB: predicated region body
PF: predicated region fallthrough
CT: control target
= control target key end

     0   :  { %9 = vsyncpa [#allocation3], 0  ;;  %s370_s0 = inlined_call_operand.hbm [shape: f32[8,128], index: 0, kind: input, shape index: {}]   ;;  %s371_s1 = inlined_call_operand.hbm [shape: f32[128,256], index: 1, kind: input, shape index: {}]   ;;  %s372_s2 = inlined_call_operand.hbm [shape: f32[1,256], index: 2, kind: input, shape index: {}]   ;;  %s373_s3 = inlined_call_operand.hbm [shape: f32[8,128], index: 3, kind: input, shape index: {}]   ;;  %s374_s4 = inlined_call_operand.hbm [shape: f32[8,256], index: 4, kind: output, shape index: {}]  }
   0x1   :  { %10 = vsyncpa [#allocation6], 0 }
   0x2   :  { %11 = vsyncpa [#allocation9], 0  ;;  %s28_s17 = sshll.u32 %s371_s1, 4  ;;  %s29_s17 = int_to_ptr.hbm [resolvable:$true] %s28_s17 }
   0x3   :  { %12 = vsyncpa [#allocation4], 0  ;;  %s323_s18 = smov [#allocation5]   ;;  %s18_s22 = sshll.u32 %s370_s0, 4  ;;  %s19_s22 = int_to_ptr.hbm [resolvable:$true] %s18_s22 }
   0x4   :  { %s30_s19 = sshll.u32 %s323_s18, 4  ;;  %s324_s23 = smov 256   ;;  %s31_s19 = int_to_ptr.vmem [resolvable:$true] %s30_s19 }
   0x5   :  { %s325_s24 = smov 16   ;;  %s326_s25 = smov [#allocation2]  }
   0x6   :  { %36 = dma.hbm_to_vmem [thread:$0]  %s29_s17, 4096, %s31_s19, [#allocation6], %s324_s23, %s324_s23, %s325_s24  }
   0x7   :  { %s20_s26 = sshll.u32 %s326_s25, 4  ;;  %s42_s29 = sshll.u32 %s372_s2, 4  ;;  %s21_s26 = int_to_ptr.vmem [resolvable:$true] %s20_s26  ;;  %s43_s29 = int_to_ptr.hbm [resolvable:$true] %s42_s29 }
   0x8   :  { %23 = dma.hbm_to_vmem [thread:$0]  %s19_s22, 128, %s21_s26, [#allocation3]  }
   0x9   :  { %s53_s5 = sshll.u32 %s373_s3, 4  ;;  %s327_s6 = smov [#allocation7]   ;;  %s54_s5 = int_to_ptr.hbm [resolvable:$true] %s53_s5 }
   0xa   :  { %s44_s7 = sshll.u32 %s327_s6, 4  ;;  %s328_s0 = smov [#allocation8]   ;;  %s45_s7 = int_to_ptr.vmem [resolvable:$true] %s44_s7 }
   0xb   :  { %47 = dma.hbm_to_vmem [thread:$0]  %s43_s29, 32, %s45_s7, [#allocation6]  }
   0xc   :  { %s55_s8 = sshll.u32 %s328_s0, 4  ;;  %s56_s8 = int_to_ptr.vmem [resolvable:$true] %s55_s8 }
   0xd   :  { %58 = dma.hbm_to_vmem [thread:$0]  %s54_s5, 128, %s56_s8, [#allocation9]  }
   0xe   :  { %315 = dma.done.wait [#allocation3], 128  }
   0xf   :  { %316 = vsyncadd [#allocation3], 4294967168 }
  0x10   :  { %317 = dma.done.wait [#allocation6], 4128  }
  0x11   :  { %318 = vsyncadd [#allocation6], 4294963168 }
  0x12   :  { %319 = dma.done.wait [#allocation9], 128  }
  0x13   :  { %320 = vsyncadd [#allocation9], 4294967168  ;;  %v106_v0 = vld [vmem:[#allocation5 + $0xf0] sm:$0xff]  ;;  %v107_v1 = vld [vmem:[#allocation5 + $0xf8] sm:$0xff]  ;;  %s329_s2 = smov [#allocation10]   ;;  %s174_s11 = sshll.u32 %s374_s4, 4  ;;  %s175_s11 = int_to_ptr.hbm [resolvable:$true] %s174_s11 }
  0x14   :  { %v104_v2 = vld [vmem:[#allocation5 + $0xe0] sm:$0xff]  ;;  %114 = vmatpush.msra.mxu0 %v106_v0  ;;  %134 = vmatpush.msra.mxu1 %v107_v1  ;;  %v105_v3 = vld [vmem:[#allocation5 + $0xe8] sm:$0xff]  ;;  %v102_v4 = vld [vmem:[#allocation5 + $0xd0] sm:$0xff]  ;;  %s172_s3 = sshll.u32 %s329_s2, 4  ;;  %s173_s3 = int_to_ptr.vmem [resolvable:$true] %s172_s3 }
  0x15   :  { %v103_v5 = vld [vmem:[#allocation5 + $0xd8] sm:$0xff]  ;;  %v100_v6 = vld [vmem:[#allocation5 + $0xc0] sm:$0xff]  ;;  %v101_v7 = vld [vmem:[#allocation5 + $0xc8] sm:$0xff] }
  0x16   :  { %115 = vmatpush.msra.mxu0 %v104_v2  ;;  %135 = vmatpush.msra.mxu1 %v105_v3  ;;  %v98_v8 = vld [vmem:[#allocation5 + $0xb0] sm:$0xff]  ;;  %v99_v9 = vld [vmem:[#allocation5 + $0xb8] sm:$0xff]  ;;  %v96_v10 = vld [vmem:[#allocation5 + $0xa0] sm:$0xff] }
  0x17   :  { %v97_v11 = vld [vmem:[#allocation5 + $0xa8] sm:$0xff]  ;;  %v94_v12 = vld [vmem:[#allocation5 + $0x90] sm:$0xff]  ;;  %v95_v13 = vld [vmem:[#allocation5 + $0x98] sm:$0xff] }
  0x18   :  { %116 = vmatpush.msra.mxu0 %v102_v4  ;;  %136 = vmatpush.msra.mxu1 %v103_v5  ;;  %v92_v14 = vld [vmem:[#allocation5 + $0x80] sm:$0xff]  ;;  %v93_v15 = vld [vmem:[#allocation5 + $0x88] sm:$0xff]  ;;  %v90_v16 = vld [vmem:[#allocation5 + $0x70] sm:$0xff] }
  0x19   :  { %v91_v17 = vld [vmem:[#allocation5 + $0x78] sm:$0xff]  ;;  %v88_v18 = vld [vmem:[#allocation5 + $0x60] sm:$0xff]  ;;  %v89_v19 = vld [vmem:[#allocation5 + $0x68] sm:$0xff] }
  0x1a   :  { %117 = vmatpush.msra.mxu0 %v100_v6  ;;  %137 = vmatpush.msra.mxu1 %v101_v7  ;;  %v86_v20 = vld [vmem:[#allocation5 + $0x50] sm:$0xff]  ;;  %v87_v21 = vld [vmem:[#allocation5 + $0x58] sm:$0xff]  ;;  %v84_v22 = vld [vmem:[#allocation5 + $0x40] sm:$0xff] }
  0x1b   :  { %v85_v23 = vld [vmem:[#allocation5 + $0x48] sm:$0xff]  ;;  %v82_v24 = vld [vmem:[#allocation5 + $0x30] sm:$0xff]  ;;  %v83_v25 = vld [vmem:[#allocation5 + $0x38] sm:$0xff] }
  0x1c   :  { %118 = vmatpush.msra.mxu0 %v98_v8  ;;  %138 = vmatpush.msra.mxu1 %v99_v9  ;;  %v80_v26 = vld [vmem:[#allocation5 + $0x20] sm:$0xff]  ;;  %v81_v27 = vld [vmem:[#allocation5 + $0x28] sm:$0xff]  ;;  %v78_v28 = vld [vmem:[#allocation5 + $0x10] sm:$0xff] }
  0x1d   :  { %v79_v29 = vld [vmem:[#allocation5 + $0x18] sm:$0xff]  ;;  %v76_v30 = vld [vmem:[#allocation5] sm:$0xff]  ;;  %v77_v31 = vld [vmem:[#allocation5 + $0x8] sm:$0xff] }
  0x1e   :  { %119 = vmatpush.msra.mxu0 %v96_v10  ;;  %139 = vmatpush.msra.mxu1 %v97_v11  ;;  %v75_v32 = vld [vmem:[#allocation2] sm:$0xff]  ;;  %v108_v33 = vld [vmem:[#allocation7] sm:$0x3]  ;;  %v158_v44 = vld [vmem:[#allocation8] sm:$0xff] }
  0x1f   :  { %v111_v34 = vperm.slane %v108_v33, 1  ;;  %v110_v37 = vperm.slane %v108_v33, 0 }
  0x20   :  { %120 = vmatpush.msra.mxu0 %v94_v12  ;;  %140 = vmatpush.msra.mxu1 %v95_v13 }
  0x22   :  { %121 = vmatpush.msra.mxu0 %v92_v14  ;;  %141 = vmatpush.msra.mxu1 %v93_v15 }
  0x24   :  { %122 = vmatpush.msra.mxu0 %v90_v16  ;;  %142 = vmatpush.msra.mxu1 %v91_v17 }
  0x26   :  { %123 = vmatpush.msra.mxu0 %v88_v18  ;;  %143 = vmatpush.msra.mxu1 %v89_v19 }
  0x28   :  { %124 = vmatpush.msra.mxu0 %v86_v20  ;;  %144 = vmatpush.msra.mxu1 %v87_v21 }
  0x2a   :  { %125 = vmatpush.msra.mxu0 %v84_v22  ;;  %145 = vmatpush.msra.mxu1 %v85_v23 }
  0x2c   :  { %126 = vmatpush.msra.mxu0 %v82_v24  ;;  %146 = vmatpush.msra.mxu1 %v83_v25 }
  0x2e   :  { %127 = vmatpush.msra.mxu0 %v80_v26  ;;  %147 = vmatpush.msra.mxu1 %v81_v27 }
  0x30   :  { %128 = vmatpush.msra.mxu0 %v78_v28  ;;  %148 = vmatpush.msra.mxu1 %v79_v29 }
  0x32   :  { %129 = vmatpush.msra.mxu0 %v76_v30  ;;  %149 = vmatpush.msra.mxu1 %v77_v31 }
  0x33   :  { %130 = vmatmul.f32.vlgmr.msra.gmra.mxu0 %v75_v32  ;;  %150 = vmatmul.f32.vlgmr.msra.gmra.mxu1 %v75_v32 }
  0xb0   :  { %v151_v35 = vpop.f32.mrf.mxu1  ;;  %v131_v38 = vpop.f32.mrf.mxu0 }
  0xb1   :  { %v152_v36 = vadd.f32 %v151_v35, %v111_v34  ;;  %v132_v41 = vadd.f32 %v131_v38, %v110_v37 }
  0xb3   :  { %v154_v39 = vmul.f32 0.5, %v152_v36  ;;  %v162_v42 = vmul.f32 %v132_v41, %v132_v41  ;;  %v161_v43 = vadd.f32 1.0, %v152_v36 }
  0xb5   :  { %v155_v40 = vmul.f32 1.442695, %v154_v39  ;;  %v163_v47 = vsub.f32 %v161_v43, %v162_v42 }
  0xb7   :  { %193 = vpow2.f32 %v155_v40 }
  0xbd   :  { %v194_v45 = vpop.eup %193 }
  0xbe   :  { %v157_v46 = vmul.f32 %v194_v45, %v194_v45  ;;  %v159_v48 = vmul.f32 %v194_v45, %v158_v44 }
  0xc0   :  { %v164_v49 = vsub.f32 %v163_v47, %v157_v46  ;;  %v160_v50 = vadd.f32 %v159_v48, %v132_v41 }
  0xc2   :  { %166 = vst [vmem:[#allocation10 + $0x8] sm:$0xff] %v164_v49 }
  0xc3   :  { %165 = vst [vmem:[#allocation10] sm:$0xff] %v160_v50 }
  0xc4   :  { %177 = dma.vmem_to_hbm [thread:$0]  %s173_s3, 256, %s175_s11, [#allocation4]  }
  0xc5   :  { %321 = dma.done.wait [#allocation4], 256  }
  0xc6   :  { %322 = vsyncadd [#allocation4], 4294967040 }
  0xc7   :  { %182 = vsyncpa [#allocation3], 1 }
  0xc8   :  { %183 = vsyncpa [#allocation6], 1 }
  0xc9   :  { %184 = vsyncpa [#allocation9], 1 }
  0xca   :  { %185 = vsyncpa [#allocation4], 1 }

</bundles_post_ra>
